<compile_context>
chip_gen: v6e
topology: v6e:2x2x1
jax: 0.10.0
libtpu: 0.0.40
codegen_flags: <defaults>
</compile_context>

<pallas_src>
import math
from functools import partial

import jax
import jax.numpy as jnp
from jax import lax
from jax.experimental import pallas as pl
from jax.experimental.pallas import tpu as pltpu

# ---- problem sizes (from the module: d_model=2, example encodings have seq=3)
SEQ = 3
D_MODEL = 2
S_PAD = 8        # sublane-aligned padding of the sequence axis
K_PAD = 8        # contraction (d_model) axis padding: 8, NOT 128
D_PAD = 128      # lane-aligned padding of each projection's output axis
NEG_BIG = -1.0e30   # finite sentinel for padded key columns (no NaN hazard)


# ---------------------------------------------------------------------------
# Kernel bodies
# ---------------------------------------------------------------------------
def _attn_core(q, k, v, out_ref, *, scale, seq=None, bias=None):
    # q @ k^T without materializing k.T (contract on the last dims).  Kept in
    # f32 on purpose: this dot never touches HBM and f32 logits avoid
    # amplifying bf16 rounding through exp().
    sims = lax.dot_general(q, k, (((1,), (1,)), ((), ())),
                           preferred_element_type=jnp.float32)   # (S_PAD, S_PAD)
    scaled = sims * scale
    if bias is None:
        # Padded key columns -> large-negative finite sentinel (compile-time).
        col_ids = lax.broadcasted_iota(jnp.int32, scaled.shape, 1)
        scaled = jnp.where(col_ids < seq, scaled, NEG_BIG)
    else:
        # User mask (-1e9, torch masked_fill semantics) and padded-column
        # sentinel are already folded into one additive bias.
        scaled = scaled + bias

    # Softmax over the key axis; approx reciprocal -> EUP slot (otherwise idle).
    m = jnp.max(scaled, axis=1, keepdims=True)
    e = jnp.exp(scaled - m)
    denom = jnp.sum(e, axis=1, keepdims=True)
    probs = e * pl.reciprocal(denom, approx=True)

    out_ref[...] = jnp.dot(probs, v, preferred_element_type=jnp.float32)


def _self_attn_kernel(x_ref, w_ref, out_ref, *, seq, scale):
    """Self-attention fast path.  x_ref: (S_PAD, K_PAD) bf16 shared LHS,
    w_ref: (K_PAD, 3*D_PAD) bf16 = [Wq^T | Wk^T | Wv^T]."""
    qkv = jnp.dot(x_ref[...], w_ref[...], preferred_element_type=jnp.float32)  # (8, 384)
    q = qkv[:, 0 * D_PAD:1 * D_PAD]   # lane-tile-aligned static slices
    k = qkv[:, 1 * D_PAD:2 * D_PAD]
    v = qkv[:, 2 * D_PAD:3 * D_PAD]
    _attn_core(q, k, v, out_ref, scale=scale, seq=seq)


def _self_attn_kernel_bias(x_ref, w_ref, bias_ref, out_ref, *, scale):
    qkv = jnp.dot(x_ref[...], w_ref[...], preferred_element_type=jnp.float32)
    q = qkv[:, 0 * D_PAD:1 * D_PAD]
    k = qkv[:, 1 * D_PAD:2 * D_PAD]
    v = qkv[:, 2 * D_PAD:3 * D_PAD]
    _attn_core(q, k, v, out_ref, scale=scale, bias=bias_ref[...])


def _cross_attn_kernel(x_ref, w_ref, out_ref, *, seq, scale):
    """General cross-attention.  x_ref: (3*S_PAD, K_PAD) = [enc_q; enc_k; enc_v].
    Three per-slice dots compute only the diagonal blocks (no wasted MXU work
    vs. a fused (24,K)@(K,384) matmul)."""
    q = jnp.dot(x_ref[0 * S_PAD:1 * S_PAD, :], w_ref[:, 0 * D_PAD:1 * D_PAD],
                preferred_element_type=jnp.float32)
    k = jnp.dot(x_ref[1 * S_PAD:2 * S_PAD, :], w_ref[:, 1 * D_PAD:2 * D_PAD],
                preferred_element_type=jnp.float32)
    v = jnp.dot(x_ref[2 * S_PAD:3 * S_PAD, :], w_ref[:, 2 * D_PAD:3 * D_PAD],
                preferred_element_type=jnp.float32)
    _attn_core(q, k, v, out_ref, scale=scale, seq=seq)


def _cross_attn_kernel_bias(x_ref, w_ref, bias_ref, out_ref, *, scale):
    q = jnp.dot(x_ref[0 * S_PAD:1 * S_PAD, :], w_ref[:, 0 * D_PAD:1 * D_PAD],
                preferred_element_type=jnp.float32)
    k = jnp.dot(x_ref[1 * S_PAD:2 * S_PAD, :], w_ref[:, 1 * D_PAD:2 * D_PAD],
                preferred_element_type=jnp.float32)
    v = jnp.dot(x_ref[2 * S_PAD:3 * S_PAD, :], w_ref[:, 2 * D_PAD:3 * D_PAD],
                preferred_element_type=jnp.float32)
    _attn_core(q, k, v, out_ref, scale=scale, bias=bias_ref[...])


# ---------------------------------------------------------------------------
# Host-side helpers (hoisted out of the per-call hot path)
# ---------------------------------------------------------------------------
def pack_qkv_weights(w_q, w_k, w_v):
    """Pad/transpose/concat the (PyTorch-layout) projection weights ONCE.
    nn.Linear(x) = x @ W^T, so we store W^T.  Returns (K_PAD, 3*D_PAD) bf16."""
    def pad_t(w):
        wt = jnp.asarray(w, jnp.float32).T
        return jnp.pad(wt, ((0, K_PAD - wt.shape[0]), (0, D_PAD - wt.shape[1])))
    return jnp.concatenate([pad_t(w_q), pad_t(w_k), pad_t(w_v)],
                           axis=1).astype(jnp.bfloat16)


def build_attention_bias(mask, seq_k):
    """Fold the user mask (True => -1e9, torch masked_fill semantics) and the
    padded-key-column sentinel (-1e30, finite) into ONE additive f32
    (S_PAD, S_PAD) bias.  Call once per *static* mask (e.g. causal)."""
    col = jnp.arange(S_PAD)
    pad_cols = jnp.where(col[None, :] < seq_k, 0.0, NEG_BIG)
    bias = jnp.broadcast_to(pad_cols, (S_PAD, S_PAD))
    user = jnp.where(jnp.asarray(mask, bool), -1.0e9, 0.0)
    user = jnp.pad(user, ((0, S_PAD - user.shape[0]), (0, S_PAD - user.shape[1])))
    return (bias + user).astype(jnp.float32)


def _pad2d(x, rows, cols):
    x = jnp.asarray(x, jnp.float32)
    return jnp.pad(x, ((0, rows - x.shape[0]), (0, cols - x.shape[1])))


def _cost(batch, x_bytes, bias_bytes):
    flops = batch * (2 * S_PAD * K_PAD * (3 * D_PAD)   # QKV projection (diag blocks)
                     + 2 * S_PAD * D_PAD * S_PAD        # q @ k^T
                     + 2 * S_PAD * S_PAD * D_PAD)       # probs @ v
    transcendentals = batch * (S_PAD * S_PAD + S_PAD)   # exp + reciprocal
    bytes_accessed = (int(x_bytes) + K_PAD * (3 * D_PAD) * 2   # bf16 weight, resident
                      + int(bias_bytes) + batch * S_PAD * D_PAD * 4)
    return pl.CostEstimate(flops=int(flops), transcendentals=int(transcendentals),
                           bytes_accessed=int(bytes_accessed))


# ---------------------------------------------------------------------------
# Wrappers (jit'ed)
# ---------------------------------------------------------------------------
@jax.jit
def self_attention_pallas(encodings, w_qkv_packed, bias=None):
    """Self-attention fast path (enc_q == enc_k == enc_v): one (8,8) input DMA.
    encodings: (seq, d_model) f32.  bias: optional build_attention_bias output.
    Returns (seq, d_model) f32."""
    seq, d_model = encodings.shape
    scale = 1.0 / math.sqrt(d_model)
    x = _pad2d(encodings, S_PAD, K_PAD).astype(jnp.bfloat16)
    vmem = pl.BlockSpec(memory_space=pltpu.MemorySpace.VMEM)
    out_shape = jax.ShapeDtypeStruct((S_PAD, D_PAD), jnp.float32)
    if bias is None:
        out = pl.pallas_call(
            partial(_self_attn_kernel, seq=seq, scale=scale),
            out_shape=out_shape, in_specs=[vmem, vmem], out_specs=vmem,
            cost_estimate=_cost(1, x.size * 2, 0),
        )(x, w_qkv_packed)
    else:
        out = pl.pallas_call(
            partial(_self_attn_kernel_bias, scale=scale),
            out_shape=out_shape, in_specs=[vmem, vmem, vmem], out_specs=vmem,
            cost_estimate=_cost(1, x.size * 2, bias.size * 4),
        )(x, w_qkv_packed, bias)
    return out[:seq, :d_model]


@jax.jit
def attention_pallas(enc_q, enc_k, enc_v, w_qkv_packed, bias=None):
    """General cross-attention path matching Attention.forward(q, k, v, mask)."""
    seq_q, d_model = enc_q.shape
    seq_k = enc_k.shape[0]
    scale = 1.0 / math.sqrt(enc_k.shape[1])   # k.size(col_dim) ** 0.5
    x = jnp.concatenate([_pad2d(enc_q, S_PAD, K_PAD),
                         _pad2d(enc_k, S_PAD, K_PAD),
                         _pad2d(enc_v, S_PAD, K_PAD)], axis=0).astype(jnp.bfloat16)
    vmem = pl.BlockSpec(memory_space=pltpu.MemorySpace.VMEM)
    out_shape = jax.ShapeDtypeStruct((S_PAD, D_PAD), jnp.float32)
    if bias is None:
        out = pl.pallas_call(
            partial(_cross_attn_kernel, seq=seq_k, scale=scale),
            out_shape=out_shape, in_specs=[vmem, vmem], out_specs=vmem,
            cost_estimate=_cost(1, x.size * 2, 0),
        )(x, w_qkv_packed)
    else:
        out = pl.pallas_call(
            partial(_cross_attn_kernel_bias, scale=scale),
            out_shape=out_shape, in_specs=[vmem, vmem, vmem], out_specs=vmem,
            cost_estimate=_cost(1, x.size * 2, bias.size * 4),
        )(x, w_qkv_packed, bias)
    return out[:seq_q, :d_model]


@jax.jit
def self_attention_pallas_batched(encodings, w_qkv_packed, bias=None):
    """Batched self-attention: ONE pallas_call, grid=(batch,).  The packed
    weight (and optional bias) have constant index_maps so they are DMA'd once
    and stay VMEM-resident; the batch axis is 'parallel' (v7x 2-TC sharding).
    encodings: (batch, seq, d_model) f32 -> (batch, seq, d_model) f32."""
    batch, seq, d_model = encodings.shape
    scale = 1.0 / math.sqrt(d_model)
    x = jnp.pad(jnp.asarray(encodings, jnp.float32),
                ((0, 0), (0, S_PAD - seq), (0, K_PAD - d_model))).astype(jnp.bfloat16)

    x_spec = pl.BlockSpec((None, S_PAD, K_PAD), lambda b: (b, 0, 0))
    w_spec = pl.BlockSpec((K_PAD, 3 * D_PAD), lambda b: (0, 0))     # VMEM-resident
    out_spec = pl.BlockSpec((None, S_PAD, D_PAD), lambda b: (b, 0, 0))
    out_shape = jax.ShapeDtypeStruct((batch, S_PAD, D_PAD), jnp.float32)
    params = pltpu.CompilerParams(dimension_semantics=("parallel",))

    if bias is None:
        out = pl.pallas_call(
            partial(_self_attn_kernel, seq=seq, scale=scale),
            out_shape=out_shape, grid=(batch,),
            in_specs=[x_spec, w_spec], out_specs=out_spec,
            compiler_params=params,
            cost_estimate=_cost(batch, x.size * 2, 0),
        )(x, w_qkv_packed)
    else:
        bias_spec = pl.BlockSpec((S_PAD, S_PAD), lambda b: (0, 0))   # VMEM-resident
        out = pl.pallas_call(
            partial(_self_attn_kernel_bias, scale=scale),
            out_shape=out_shape, grid=(batch,),
            in_specs=[x_spec, w_spec, bias_spec], out_specs=out_spec,
            compiler_params=params,
            cost_estimate=_cost(batch, x.size * 2, bias.size * 4),
        )(x, w_qkv_packed, bias)
    return out[:, :seq, :d_model]


# ---------------------------------------------------------------------------
# Pure-JAX reference (module semantics) and test harness
# ---------------------------------------------------------------------------
def attention_ref(enc_q, enc_k, enc_v, w_q, w_k, w_v, mask=None):
    P = lax.Precision.HIGHEST
    q = jnp.matmul(enc_q, w_q.T, precision=P)
    k = jnp.matmul(enc_k, w_k.T, precision=P)
    v = jnp.matmul(enc_v, w_v.T, precision=P)
    scaled = jnp.matmul(q, k.T, precision=P) / math.sqrt(k.shape[1])
    if mask is not None:
        scaled = jnp.where(mask, -1.0e9, scaled)
    return jnp.matmul(jax.nn.softmax(scaled, axis=1), v, precision=P)


def _bf16(x):  # bf16 round-trip (the kernel's deliberate operand precision)
    return jnp.asarray(x, jnp.float32).astype(jnp.bfloat16).astype(jnp.float32)


if __name__ == "__main__":
    encodings = jnp.array([[1.16, 0.23],
                           [0.57, 1.36],
                           [4.41, -2.16]], dtype=jnp.float32)

    key = jax.random.PRNGKey(0)
    kq, kk, kv, kb = jax.random.split(key, 4)
    bound = 1.0 / math.sqrt(D_MODEL)   # PyTorch default U(-1/sqrt(fan_in), +1/sqrt(fan_in))
    w_q = jax.random.uniform(kq, (D_MODEL, D_MODEL), jnp.float32, -bound, bound)
    w_k = jax.random.uniform(kk, (D_MODEL, D_MODEL), jnp.float32, -bound, bound)
    w_v = jax.random.uniform(kv, (D_MODEL, D_MODEL), jnp.float32, -bound, bound)

    # Pack/pad the loop-invariant weights ONCE, outside the per-call path.
    w_qkv = pack_qkv_weights(w_q, w_k, w_v)

    def check(out, eq, ek, ev, mask=None):
        # Tight: kernel math at its chosen operand precision (bf16 enc/weights,
        # f32 accumulation everywhere).
        ref_q = attention_ref(_bf16(eq), _bf16(ek), _bf16(ev),
                              _bf16(w_q), _bf16(w_k), _bf16(w_v), mask)
        assert jnp.allclose(out, ref_q, atol=5e-3, rtol=5e-3), (out, ref_q)
        # Sanity vs. exact f32 module semantics (bf16 operand quantization is
        # the only additional deviation).
        ref = attention_ref(eq, ek, ev, w_q, w_k, w_v, mask)
        assert jnp.allclose(out, ref, atol=1e-1, rtol=1e-1), (out, ref)

    # --- self-attention fast path, no mask ---------------------------------
    out = jax.block_until_ready(self_attention_pallas(encodings, w_qkv))
    assert out.shape == (SEQ, D_MODEL)
    check(out, encodings, encodings, encodings)

    # --- general cross-attention path (same tensors here) ------------------
    out_x = jax.block_until_ready(
        attention_pallas(encodings, encodings, encodings, w_qkv))
    check(out_x, encodings, encodings, encodings)

    # --- masked path (causal mask, torch masked_fill semantics) ------------
    mask = jnp.triu(jnp.ones((SEQ, SEQ), dtype=bool), k=1)
    bias = build_attention_bias(mask, SEQ)   # built ONCE for the static mask
    out_m = jax.block_until_ready(self_attention_pallas(encodings, w_qkv, bias))
    check(out_m, encodings, encodings, encodings, mask)
    out_xm = jax.block_until_ready(
        attention_pallas(encodings, encodings, encodings, w_qkv, bias))
    check(out_xm, encodings, encodings, encodings, mask)

    # --- batched self-attention: one pallas_call, VMEM-resident weight ------
    B = 4
    enc_b = jax.random.uniform(kb, (B, SEQ, D_MODEL), jnp.float32, -2.0, 2.0)
    out_b = jax.block_until_ready(self_attention_pallas_batched(enc_b, w_qkv))
    assert out_b.shape == (B, SEQ, D_MODEL)
    for i in range(B):
        check(out_b[i], enc_b[i], enc_b[i], enc_b[i])
    out_bm = jax.block_until_ready(self_attention_pallas_batched(enc_b, w_qkv, bias))
    for i in range(B):
        check(out_bm[i], enc_b[i], enc_b[i], enc_b[i], mask)

    print("KERNEL_OK")
</pallas_src>

<mosaic_0001>
module attributes {stable_mosaic.version = 11 : i64} {
  func.func @_self_attn_kernel(%arg0: memref<8x8xbf16, #tpu.memory_space<vmem>>, %arg1: memref<8x384xbf16, #tpu.memory_space<vmem>>, %arg2: memref<8x128xf32, #tpu.memory_space<vmem>>) attributes {dimension_semantics = [], scalar_prefetch = 0 : i64, scratch_operands = 0 : i64, tpu.core_type = #tpu.core_type<tc>} {
    %c0 = arith.constant 0 : index
    %c0_0 = arith.constant 0 : index
    %0 = vector.load %arg0[%c0, %c0_0] : memref<8x8xbf16, #tpu.memory_space<vmem>>, vector<8x8xbf16>
    %c0_1 = arith.constant 0 : index
    %c0_2 = arith.constant 0 : index
    %1 = vector.load %arg1[%c0_1, %c0_2] : memref<8x384xbf16, #tpu.memory_space<vmem>>, vector<8x384xbf16>
    %cst = arith.constant dense<0.000000e+00> : vector<8x384xf32>
    %2 = tpu.matmul %0, %1, %cst {dimension_numbers = #tpu.dot_dimension_numbers<[1], [0], [0], [1], [0, 0, 1, 1], [], []>} : vector<8x8xbf16>, vector<8x384xbf16>, vector<8x384xf32> -> vector<8x384xf32>
    %3 = vector.extract_strided_slice %2 {offsets = [0, 0], sizes = [8, 128], strides = [1, 1]} : vector<8x384xf32> to vector<8x128xf32>
    %4 = vector.extract_strided_slice %2 {offsets = [0, 128], sizes = [8, 128], strides = [1, 1]} : vector<8x384xf32> to vector<8x128xf32>
    %5 = vector.extract_strided_slice %2 {offsets = [0, 256], sizes = [8, 128], strides = [1, 1]} : vector<8x384xf32> to vector<8x128xf32>
    %cst_3 = arith.constant dense<0.000000e+00> : vector<8x8xf32>
    %6 = tpu.matmul %3, %4, %cst_3 {dimension_numbers = #tpu.dot_dimension_numbers<[1], [1], [0], [0], [0, 0, 1, 0], [], []>} : vector<8x128xf32>, vector<8x128xf32>, vector<8x8xf32> -> vector<8x8xf32>
    %cst_4 = arith.constant 0.707106769 : f32
    %7 = vector.broadcast %cst_4 : f32 to vector<8x8xf32>
    %8 = arith.mulf %6, %7 : vector<8x8xf32>
    %9 = tpu.iota {dimensions = array<i32: 1>} : vector<8x8xi32>
    %c3_i32 = arith.constant 3 : i32
    %10 = vector.broadcast %c3_i32 : i32 to vector<8x8xi32>
    %11 = arith.cmpi slt, %9, %10 : vector<8x8xi32>
    %cst_5 = arith.constant -1.000000e+30 : f32
    %12 = vector.broadcast %cst_5 : f32 to vector<8x8xf32>
    %13 = arith.select %11, %8, %12 : vector<8x8xi1>, vector<8x8xf32>
    %cst_6 = arith.constant dense<0xFF800000> : vector<8xf32>
    %14 = vector.multi_reduction <maximumf>, %13, %cst_6 [1] : vector<8x8xf32> to vector<8xf32>
    %15 = vector.shape_cast %14 : vector<8xf32> to vector<8x1xf32>
    %16 = vector.broadcast %15 : vector<8x1xf32> to vector<8x8xf32>
    %17 = arith.subf %13, %16 : vector<8x8xf32>
    %18 = math.exp %17 : vector<8x8xf32>
    %cst_7 = arith.constant dense<0.000000e+00> : vector<8xf32>
    %19 = vector.multi_reduction <add>, %18, %cst_7 [1] : vector<8x8xf32> to vector<8xf32>
    %20 = vector.shape_cast %19 : vector<8xf32> to vector<8x1xf32>
    %21 = tpu.reciprocal %20 {approx = true} : vector<8x1xf32> -> vector<8x1xf32>
    %22 = vector.broadcast %21 : vector<8x1xf32> to vector<8x8xf32>
    %23 = arith.mulf %18, %22 : vector<8x8xf32>
    %cst_8 = arith.constant dense<0.000000e+00> : vector<8x128xf32>
    %24 = tpu.matmul %23, %5, %cst_8 {dimension_numbers = #tpu.dot_dimension_numbers<[1], [0], [0], [1], [0, 0, 1, 1], [], []>} : vector<8x8xf32>, vector<8x128xf32>, vector<8x128xf32> -> vector<8x128xf32>
    %c0_9 = arith.constant 0 : index
    %c0_10 = arith.constant 0 : index
    %25 = vector.load %arg2[%c0_9, %c0_10] : memref<8x128xf32, #tpu.memory_space<vmem>>, vector<8x128xf32>
    tpu.vector_store %arg2[%c0_9, %c0_10], %24 {strides = array<i32>} : memref<8x128xf32, #tpu.memory_space<vmem>>, vector<8x128xf32>,
    return
  }
}

</mosaic_0001>

<bundles_post_ra>
// kernel: self_attention_pallas.1
= control target key start
LH: loop header
LB: loop body
LE: loop exit
PB: predicated region body
PF: predicated region fallthrough
CT: control target
= control target key end

     0   :  { %vm27_vm0 = vcmask 1043456   ;;  %v321_v1 = vmov 0   ;;  %vm23_vm1 = vcmask 64512   ;;  %v322_v6 = vmov 0.0   ;;  %s359_s1 = inlined_call_operand.vmem [shape: bf16[8,384], index: 1, kind: input, shape index: {}]   ;;  %s360_s0 = inlined_call_operand.vmem [shape: bf16[8,8], index: 0, kind: input, shape index: {}]   ;;  %s361_s2 = inlined_call_operand.vmem [shape: f32[8,128], index: 2, kind: output, shape index: {}]  }
   0x1   :  { %v13_v0 = vld [vmem:[%s359_s1] sm:$0xff]  ;;  %69 = vmatprep.mubr.bf16.mxu0 %v321_v1  ;;  %295 = vmatprep.subr.bf16.mxu1 %v322_v6  ;;  %vm323_vm2 = vmmov 0   ;;  %v316_v11 = vld [vmem:[%s359_s1 + $0x8] ss:$0 sps:$4 sm:$0xff]   ;;  %v189_v13 = vlaneseq }
   0x2   :  { %v283_v2 = vcombine.high %v13_v0, %v13_v0  ;;  %v282_v3 = vcombine.low %v13_v0, %v13_v0  ;;  %v12_v5 = vld [vmem:[%s360_s0] sm:$0xf]  ;;  %297 = vmatprep.mubr.msk.bf16.mxu1 %vm323_vm2, %v322_v6  ;;  %v35_v12 = vsel %vm27_vm0, %v316_v11, 0 }
   0x3   :  { %296 = vmatpush3.bf16.msra.mxu1 %v35_v12  ;;  %v190_v14 = vand.u32 127, %v189_v13 }
   0x4   :  { %285 = vmatprep.subr.msk.bf16.mxu0 %vm27_vm0, %v283_v2  ;;  %v29_v4 = vsel %vm27_vm0, %v282_v3, 0  ;;  %306 = vmatprep.subr.mxu1 %v322_v6 }
   0x5   :  { %52 = vmatpush1.bf16.msra.mxu0 %v29_v4  ;;  %vm191_vm3 = vcmp.lt.s32.totalorder %v190_v14, 3 }
   0x6   :  { %301 = vmatprep.subr.mxu0 %v322_v6  ;;  %298 = vmatmul.mubr.msk.bf16.vlgmr.msra.gmra.mxu1 %vm23_vm1, %v12_v5 }
   0x7   :  { %308 = vmatprep.mubr.msk.f32.mxu1 %vm323_vm2, %v322_v6 }
   0x8   :  { %286 = vmatmul.mubr.msk.bf16.vlgmr.msra.gmra.mxu0 %vm23_vm1, %v12_v5 }
   0x9   :  { %303 = vmatprep.mubr.msk.f32.mxu0 %vm323_vm2, %v322_v6 }
  0xc6   :  { %v112_v25 = vpop.f32.mrf.mxu1 }
  0xc7   :  { %307 = vmatpush3.msra.mxu1 %v112_v25 }
  0xc8   :  { %v71_v7 = vpop.f32.mrf.mxu0  ;;  %v299_v26 = vpop.f32.mrf.mxu1 }
  0xca   :  { %v73_v8 = vpop.f32.mrf.mxu0  ;;  %v115_v27 = vpop.f32.mrf.mxu1 }
  0xcb   :  { %302 = vmatpush3.xpose.msra.mxu0 %v73_v8 }
  0xcc   :  { %v75_v9 = vpop.f32.mrf.mxu0  ;;  %v300_v28 = vpop.f32.mrf.mxu1 }
  0xce   :  { %v76_v10 = vpop.f32.mrf.mxu0  ;;  %304 = vmatmul.mubr.f32.vlgmr.msra.gmra.mxu0 %v71_v7 }
 0x18e   :  { %v184_v15 = vpop.f32.mrf.mxu0 }
 0x18f   :  { %v188_v16 = vmul.f32 0.70710677, %v184_v15 }
 0x190   :  { %v305_v17 = vpop.f32.mrf.mxu0 }
 0x191   :  { %v192_v18 = vsel %vm191_vm3, %v188_v16, -1e+30 }
 0x192   :  { %v193_v19 = vsel %vm23_vm1, %v192_v18, -inf }
 0x193   :  { %194 = vmax.xlane.f32.xlu0 %v193_v19 }
 0x21c   :  { %v195_v20 = vpop.xlane.xlu0 %194 }
 0x21d   :  { %v196_v21 = vsub.f32 %v192_v18, %v195_v20 }
 0x21f   :  { %v197_v22 = vmul.f32 1.442695, %v196_v21 }
 0x221   :  { %317 = vpow2.f32 %v197_v22 }
 0x22e   :  { %v318_v23 = vpop.eup %317 }
 0x22f   :  { %v199_v24 = vsel %vm23_vm1, %v318_v23, 0.0 }
 0x230   :  { %200 = vadd.xlane.f32.xlu0 %v199_v24 }
 0x2b9   :  { %v201_v29 = vpop.xlane.xlu0 %200 }
 0x2ba   :  { %319 = vrcp.f32 %v201_v29 }
 0x2c7   :  { %v320_v30 = vpop.eup %319 }
 0x2c8   :  { %v203_v31 = vmul.f32 %v320_v30, %v318_v23 }
 0x2ca   :  { %309 = vmatmul.mubr.msk.f32.vlgmr.msra.gmra.mxu1 %vm23_vm1, %v203_v31 }
 0x38a   :  { %v273_v32 = vpop.f32.mrf.mxu1 }
 0x38b   :  { %277 = vst [vmem:[%s361_s2] sm:$0xff] %v273_v32 }
 0x38c   :  { %v310_v33 = vpop.f32.mrf.mxu1 }

</bundles_post_ra>
